<compile_context>
chip_gen: v6e
topology: v6e:2x2x1
jax: 0.10.0
libtpu: 0.0.40
codegen_flags: <defaults>
</compile_context>

<pallas_src>
import math

import jax
import jax.numpy as jnp
from jax import lax
from jax.experimental import pallas as pl
from jax.experimental.pallas import tpu as pltpu

_BN_EPS = 1e-5


# ----------------------------- small helpers ---------------------------------

def _tpu_vmem_capacity_bytes():
    try:
        return int(pltpu.get_tpu_info().vmem_capacity_bytes)
    except Exception:
        return 64 << 20  # conservative default (v7x per-TensorCore VMEM)


def _vmem_limit(est_bytes, cap):
    est = int(est_bytes * 1.25) + (2 << 20)          # headroom for compiler scratch
    return min(max(est, 32 << 20), int(0.9 * cap))


def _pick_tile_n(D, w_itemsize, w_pair_budget):
    """Column-tile width: lane-dense multiple of 128, sized so a double-buffered
    (D, tn) weight tile fits the per-generation budget, with >= 2 grid steps
    whenever possible (v7x two-TensorCore split of the 'parallel' axis)."""
    tn = None
    for cand in (1024, 512, 256, 128):
        if D % cand != 0:
            continue
        if 2 * D * cand * w_itemsize <= w_pair_budget or cand == 128:
            tn = cand
            break
    if tn is None:
        return D  # small / non-128-multiple D: one full-width tile
    while D // tn < 2 and tn > 128 and tn % 256 == 0:
        tn //= 2
    return tn


def _pick_tile_m(B, D, x_itemsize, row_budget):
    """Row-tile height for the two-pass path (multiple of 8, divides B)."""
    tm = None
    for cand in (512, 256, 128, 64, 32, 16, 8):
        if B % cand == 0:
            tm = cand
            break
    if tm is None:
        tm = B
    while tm > 8 and B % (tm // 2) == 0 and 2 * tm * D * x_itemsize > row_budget:
        tm //= 2
    return tm


def _sigmoid(x):
    # Exact sigmoid (matches torch.sigmoid): exp on the EUP + exact divide.
    # (Replaces the previous approx-reciprocal version; tolerances tightened.)
    return 1.0 / (1.0 + jnp.exp(-x))


# ----------------------------- resident-LHS kernels ---------------------------

def _bn_gates(x_full, w_ref, gb_ref):
    """(B, tn) training-mode BatchNorm'd gates for one column tile.
    Centered variance (not E[g^2]-mean^2) to avoid cancellation."""
    gates = jnp.dot(x_full, w_ref[...], preferred_element_type=jnp.float32)
    inv_b = 1.0 / gates.shape[0]
    mean = jnp.sum(gates, axis=0, keepdims=True) * inv_b
    centered = gates - mean
    var = jnp.sum(centered * centered, axis=0, keepdims=True) * inv_b
    scale = lax.rsqrt(var + _BN_EPS) * gb_ref[0:1, :]        # gamma row
    return centered * scale + gb_ref[1:2, :]                 # + beta row


def _resident_col_tile(x_full_ref, tn):
    """Column tile of the VMEM-resident LHS (no second x HBM stream).
    tn is a multiple of 128 on this path, so the dynamic lane slice is aligned."""
    if tn == x_full_ref.shape[1]:
        return x_full_ref[...]
    start = pl.multiple_of(pl.program_id(0) * tn, 128)
    return x_full_ref[:, pl.ds(start, tn)]


def _make_resident_kernel(add_batch_norm, slice_lhs):
    if add_batch_norm and slice_lhs:
        def kernel(x_full_ref, w_ref, gb_ref, o_ref):
            gates = _bn_gates(x_full_ref[...], w_ref, gb_ref)
            x_tile = _resident_col_tile(x_full_ref, w_ref.shape[1])
            o_ref[...] = (x_tile.astype(jnp.float32) * _sigmoid(gates)).astype(o_ref.dtype)
    elif add_batch_norm:
        def kernel(x_full_ref, x_tile_ref, w_ref, gb_ref, o_ref):
            gates = _bn_gates(x_full_ref[...], w_ref, gb_ref)
            o_ref[...] = (x_tile_ref[...].astype(jnp.float32) * _sigmoid(gates)).astype(o_ref.dtype)
    elif slice_lhs:
        def kernel(x_full_ref, w_ref, bias_ref, o_ref):
            gates = jnp.dot(x_full_ref[...], w_ref[...],
                            preferred_element_type=jnp.float32) + bias_ref[...]
            x_tile = _resident_col_tile(x_full_ref, w_ref.shape[1])
            o_ref[...] = (x_tile.astype(jnp.float32) * _sigmoid(gates)).astype(o_ref.dtype)
    else:
        def kernel(x_full_ref, x_tile_ref, w_ref, bias_ref, o_ref):
            gates = jnp.dot(x_full_ref[...], w_ref[...],
                            preferred_element_type=jnp.float32) + bias_ref[...]
            o_ref[...] = (x_tile_ref[...].astype(jnp.float32) * _sigmoid(gates)).astype(o_ref.dtype)
    return kernel


def _resident_call(x, w, param_rows, add_batch_norm, tn, n_wbuf, vmem_limit, optimized):
    """Single-pass kernel: column grid over output features, full-batch LHS
    resident in VMEM (BN stats are per-feature, so each tile is self-contained)."""
    B, D = x.shape
    grid = (D // tn,)

    if optimized:
        # Constant-index resident LHS -> single buffer; deeper W stream.
        x_full_spec = pl.BlockSpec((B, D), lambda j: (0, 0), pipeline_mode=pl.Buffered(1))
        w_spec = pl.BlockSpec((D, tn), lambda j: (0, j), pipeline_mode=pl.Buffered(n_wbuf))
    else:
        x_full_spec = pl.BlockSpec((B, D), lambda j: (0, 0))
        w_spec = pl.BlockSpec((D, tn), lambda j: (0, j))
    p_spec = pl.BlockSpec((param_rows.shape[0], tn), lambda j: (0, j))
    out_spec = pl.BlockSpec((B, tn), lambda j: (0, j))

    in_specs = [x_full_spec]
    args = [x]
    if not optimized:
        # Portable variant: stream the gating-multiply column tile of x
        # (one extra B*D HBM pass total) instead of slicing the resident LHS.
        in_specs.append(pl.BlockSpec((B, tn), lambda j: (0, j)))
        args.append(x)
    in_specs += [w_spec, p_spec]
    args += [w, param_rows]

    x_reads = 1 if optimized else 2
    cost = pl.CostEstimate(
        flops=2 * B * D * D,
        transcendentals=B * D,
        bytes_accessed=(x_reads * B * D * x.dtype.itemsize
                        + D * D * w.dtype.itemsize
                        + B * D * x.dtype.itemsize))

    out = pl.pallas_call(
        _make_resident_kernel(add_batch_norm, slice_lhs=optimized),
        out_shape=jax.ShapeDtypeStruct((B, D), x.dtype),
        grid=grid,
        in_specs=in_specs,
        out_specs=out_spec,
        compiler_params=pltpu.CompilerParams(
            dimension_semantics=("parallel",),
            vmem_limit_bytes=vmem_limit),
        cost_estimate=cost,
    )(*args)
    return jax.block_until_ready(out)


# ----------------------------- two-pass fallback ------------------------------

def _stats_kernel(x_row_ref, w_ref, sum_ref, sumsq_ref):
    """Pass 1: per-column sum / sum-of-squares of gates, accumulated over row tiles."""
    @pl.when(pl.program_id(1) == 0)
    def _():
        sum_ref[...] = jnp.zeros_like(sum_ref)
        sumsq_ref[...] = jnp.zeros_like(sumsq_ref)
    gates = jnp.dot(x_row_ref[...], w_ref[...], preferred_element_type=jnp.float32)
    sum_ref[...] += jnp.sum(gates, axis=0, keepdims=True)
    sumsq_ref[...] += jnp.sum(gates * gates, axis=0, keepdims=True)


def _apply_kernel(x_row_ref, x_col_ref, w_ref, ss_ref, o_ref):
    """Pass 2: recompute the gates tile, apply folded scale/shift + sigmoid + gate."""
    gates = jnp.dot(x_row_ref[...], w_ref[...], preferred_element_type=jnp.float32)
    gates = gates * ss_ref[0:1, :] + ss_ref[1:2, :]
    o_ref[...] = (x_col_ref[...].astype(jnp.float32) * _sigmoid(gates)).astype(o_ref.dtype)


def _two_pass_call(x, w, add_batch_norm, gamma, beta, gating_biases, tn, tm, cap):
    B, D = x.shape
    grid = (D // tn, B // tm)
    x_item, w_item = x.dtype.itemsize, w.dtype.itemsize

    x_row_spec = pl.BlockSpec((tm, D), lambda j, i: (i, 0))
    w_spec = pl.BlockSpec((D, tn), lambda j, i: (0, j))

    if add_batch_norm:
        est1 = 2 * tm * D * x_item + 2 * D * tn * w_item + 2 * tm * tn * 4 + 8 * tn * 4
        gsum, gsumsq = pl.pallas_call(
            _stats_kernel,
            out_shape=(jax.ShapeDtypeStruct((1, D), jnp.float32),
                       jax.ShapeDtypeStruct((1, D), jnp.float32)),
            grid=grid,
            in_specs=[x_row_spec, w_spec],
            out_specs=(pl.BlockSpec((1, tn), lambda j, i: (0, j)),
                       pl.BlockSpec((1, tn), lambda j, i: (0, j))),
            compiler_params=pltpu.CompilerParams(
                dimension_semantics=("parallel", "arbitrary"),
                vmem_limit_bytes=_vmem_limit(est1, cap)),
        )(x, w)
        mean = gsum / B
        # TODO(synk): E[g^2]-mean^2 is cancellation-prone for large |mean|; a
        # centered second stats pass would match PyTorch bit-for-bit.
        var = jnp.maximum(gsumsq / B - mean * mean, 0.0)
        scale = gamma.reshape(1, D).astype(jnp.float32) * lax.rsqrt(var + _BN_EPS)
        shift = beta.reshape(1, D).astype(jnp.float32) - mean * scale
    else:
        scale = jnp.ones((1, D), jnp.float32)
        shift = gating_biases.reshape(1, D).astype(jnp.float32)
    ss = jnp.concatenate([scale, shift], axis=0)               # (2, D) fused

    est2 = (2 * tm * D * x_item + 2 * tm * tn * x_item + 2 * D * tn * w_item
            + 2 * tm * tn * x_item + 2 * tm * tn * 4 + 8 * tn * 4)
    out = pl.pallas_call(
        _apply_kernel,
        out_shape=jax.ShapeDtypeStruct((B, D), x.dtype),
        grid=grid,
        in_specs=[x_row_spec,
                  pl.BlockSpec((tm, tn), lambda j, i: (i, j)),
                  w_spec,
                  pl.BlockSpec((2, tn), lambda j, i: (0, j))],
        out_specs=pl.BlockSpec((tm, tn), lambda j, i: (i, j)),
        compiler_params=pltpu.CompilerParams(
            dimension_semantics=("parallel", "arbitrary"),
            vmem_limit_bytes=_vmem_limit(est2, cap)),
        cost_estimate=pl.CostEstimate(
            flops=2 * B * D * D,
            transcendentals=B * D,
            bytes_accessed=(2 * B * D * x_item
                            + (B // tm) * D * D * w_item
                            + B * D * x_item)),
    )(x, x, w, ss)
    return jax.block_until_ready(out)


# ----------------------------- public wrapper ---------------------------------

def gating_context(x, gating_weights, *, add_batch_norm=True, gamma=None, beta=None,
                   gating_biases=None, tn=None, weight_dtype=None, force_two_pass=False):
    """Pallas implementation of GatingContext.forward.

    x:               (B, D) activations
    gating_weights:  (D, D)
    gamma/beta:      (D,)   BN affine params   (add_batch_norm=True)
    gating_biases:   (D,)   learned bias       (add_batch_norm=False)
    weight_dtype:    e.g. jnp.bfloat16 to halve weight HBM traffic (f32 accumulate)
    """
    assert x.ndim == 2, "GatingContext expects (batch, dim) activations"
    B, D = x.shape
    assert gating_weights.shape == (D, D)

    if not add_batch_norm and gating_biases is None:
        raise ValueError("gating_biases is required when add_batch_norm=False")
    if add_batch_norm:
        if gamma is None:
            gamma = jnp.ones((D,), jnp.float32)
        if beta is None:
            beta = jnp.zeros((D,), jnp.float32)

    # Optional bf16 weight streaming (kernel is weight-DMA-bound for modest B
    # on v5e/v6e/v7x).  Off by default to preserve exact f32 semantics.
    w = gating_weights if weight_dtype is None else gating_weights.astype(weight_dtype)

    cap = _tpu_vmem_capacity_bytes()
    x_item, w_item, out_item = x.dtype.itemsize, w.dtype.itemsize, x.dtype.itemsize

    if tn is None:
        tn = _pick_tile_n(D, w_item, cap // 4)
    assert D % tn == 0, "column tile width must divide the feature dim"
    grid_steps = D // tn
    n_wbuf = 3 if (grid_steps >= 3 and 3 * D * tn * w_item <= cap // 4) else 2

    # Footprint of the single-pass (resident-LHS) kernel, including the
    # portable fallback's streamed (B, tn) tile buffers.
    resident_bytes = (B * D * x_item                 # resident LHS (1 buffer)
                      + n_wbuf * D * tn * w_item     # weight column tiles
                      + 2 * B * tn * x_item          # fallback's streamed x tile
                      + 2 * B * tn * out_item        # output tiles
                      + 3 * B * tn * 4               # f32 gates working set
                      + 8 * tn * 4)                  # gamma/beta (or bias) rows

    use_resident = (not force_two_pass) and resident_bytes <= int(0.7 * cap)

    if use_resident:
        if add_batch_norm:
            param_rows = jnp.stack([gamma.astype(jnp.float32).reshape(D),
                                    beta.astype(jnp.float32).reshape(D)], axis=0)
        else:
            param_rows = gating_biases.astype(jnp.float32).reshape(1, D)
        vmem_limit = _vmem_limit(resident_bytes, cap)
        try:
            # Preferred: slice the gating-multiply tile out of the resident LHS
            # (no second x HBM stream), Buffered(1) LHS, Buffered(n) weights.
            return _resident_call(x, w, param_rows, add_batch_norm, tn,
                                  n_wbuf, vmem_limit, optimized=True)
        except Exception:
            # Portable fallback (previously verified structure): stream an x
            # column tile instead; everything else identical.
            return _resident_call(x, w, param_rows, add_batch_norm, tn,
                                  n_wbuf, vmem_limit, optimized=False)

    # Two-pass path: exact full-batch BN stats without requiring (B, D) to be
    # VMEM-resident.
    tm = _pick_tile_m(B, D, x_item, cap // 3)
    return _two_pass_call(x, w, add_batch_norm, gamma, beta, gating_biases, tn, tm, cap)


# ----------------------------- reference (plain JAX) --------------------------

def gating_context_ref(x, gating_weights, *, add_batch_norm=True,
                       gamma=None, beta=None, gating_biases=None):
    gates = x @ gating_weights
    if add_batch_norm:
        mean = jnp.mean(gates, axis=0, keepdims=True)
        var = jnp.mean((gates - mean) ** 2, axis=0, keepdims=True)
        gates = (gates - mean) / jnp.sqrt(var + _BN_EPS) * gamma + beta
    else:
        gates = gates + gating_biases
    return x * jax.nn.sigmoid(gates)


# ----------------------------- main -------------------------------------------

if __name__ == "__main__":
    # Small shapes; the tile picker chooses tn=128 -> a real 2-step column grid.
    B, D = 16, 256

    key = jax.random.PRNGKey(0)
    kx, kw, kb = jax.random.split(key, 3)

    x = jax.random.normal(kx, (B, D), dtype=jnp.float32)
    # gating_weights = randn(dim, dim) / sqrt(dim), matching the module init.
    gating_weights = jax.random.normal(kw, (D, D), dtype=jnp.float32) / math.sqrt(D)
    # BatchNorm1d default affine init: weight=1, bias=0.
    gamma = jnp.ones((D,), dtype=jnp.float32)
    beta = jnp.zeros((D,), dtype=jnp.float32)
    # bias variant init: randn(dim) / sqrt(dim).
    gating_biases = jax.random.normal(kb, (D,), dtype=jnp.float32) / math.sqrt(D)

    TOL = dict(atol=2e-3, rtol=2e-3)   # exact sigmoid -> tighter than before

    # --- add_batch_norm=True (default), resident single-pass path ---
    out_bn = gating_context(x, gating_weights, add_batch_norm=True,
                            gamma=gamma, beta=beta)
    out_bn = jax.block_until_ready(out_bn)
    ref_bn = gating_context_ref(x, gating_weights, add_batch_norm=True,
                                gamma=gamma, beta=beta)
    assert jnp.allclose(out_bn, ref_bn, **TOL), float(jnp.max(jnp.abs(out_bn - ref_bn)))

    # --- add_batch_norm=False, resident single-pass path ---
    out_b = gating_context(x, gating_weights, add_batch_norm=False,
                           gating_biases=gating_biases)
    out_b = jax.block_until_ready(out_b)
    ref_b = gating_context_ref(x, gating_weights, add_batch_norm=False,
                               gating_biases=gating_biases)
    assert jnp.allclose(out_b, ref_b, **TOL), float(jnp.max(jnp.abs(out_b - ref_b)))

    # --- force the large-B*D two-pass path (stats kernel + apply kernel) ---
    out_bn2 = gating_context(x, gating_weights, add_batch_norm=True,
                             gamma=gamma, beta=beta, force_two_pass=True)
    out_bn2 = jax.block_until_ready(out_bn2)
    assert jnp.allclose(out_bn2, ref_bn, **TOL), float(jnp.max(jnp.abs(out_bn2 - ref_bn)))

    # --- two-pass path, bias variant ---
    out_b2 = gating_context(x, gating_weights, add_batch_norm=False,
                            gating_biases=gating_biases, force_two_pass=True)
    out_b2 = jax.block_until_ready(out_b2)
    assert jnp.allclose(out_b2, ref_b, **TOL), float(jnp.max(jnp.abs(out_b2 - ref_b)))

    print("KERNEL_OK")
</pallas_src>

<mosaic_0001>
module attributes {stable_mosaic.version = 11 : i64} {
  func.func @kernel(%arg0: i32, %arg1: memref<16x256xf32, #tpu.memory_space<vmem>>, %arg2: memref<256x128xf32, #tpu.memory_space<vmem>>, %arg3: memref<2x128xf32, #tpu.memory_space<vmem>>, %arg4: memref<16x128xf32, #tpu.memory_space<vmem>>) attributes {dimension_semantics = [#tpu.dimension_semantics<parallel>], iteration_bounds = array<i64: 2>, scalar_prefetch = 0 : i64, scratch_operands = 0 : i64, tpu.core_type = #tpu.core_type<tc>, window_params = [{pipeline_mode = #tpu.pipeline_mode<synchronous>, transform_indices = @transform_0, window_bounds = array<i64: 16, 256>}, {pipeline_mode = #tpu.pipeline_mode<double_buffered>, transform_indices = @transform_1, window_bounds = array<i64: 256, 128>}, {transform_indices = @transform_2, window_bounds = array<i64: 2, 128>}, {transform_indices = @transform_3, window_bounds = array<i64: 16, 128>}]} {
    %c0 = arith.constant 0 : index
    %c0_0 = arith.constant 0 : index
    %0 = vector.load %arg1[%c0, %c0_0] : memref<16x256xf32, #tpu.memory_space<vmem>>, vector<16x256xf32>
    %c0_1 = arith.constant 0 : index
    %c0_2 = arith.constant 0 : index
    %1 = vector.load %arg2[%c0_1, %c0_2] : memref<256x128xf32, #tpu.memory_space<vmem>>, vector<256x128xf32>
    %cst = arith.constant dense<0.000000e+00> : vector<16x128xf32>
    %2 = tpu.matmul %0, %1, %cst {dimension_numbers = #tpu.dot_dimension_numbers<[1], [0], [0], [1], [0, 0, 1, 1], [], []>} : vector<16x256xf32>, vector<256x128xf32>, vector<16x128xf32> -> vector<16x128xf32>
    %cst_3 = arith.constant dense<0.000000e+00> : vector<128xf32>
    %3 = vector.multi_reduction <add>, %2, %cst_3 [0] : vector<16x128xf32> to vector<128xf32>
    %4 = vector.shape_cast %3 : vector<128xf32> to vector<1x128xf32>
    %cst_4 = arith.constant 6.250000e-02 : f32
    %5 = vector.broadcast %cst_4 : f32 to vector<1x128xf32>
    %6 = arith.mulf %4, %5 : vector<1x128xf32>
    %7 = vector.broadcast %6 : vector<1x128xf32> to vector<16x128xf32>
    %8 = arith.subf %2, %7 : vector<16x128xf32>
    %9 = arith.mulf %8, %8 : vector<16x128xf32>
    %cst_5 = arith.constant dense<0.000000e+00> : vector<128xf32>
    %10 = vector.multi_reduction <add>, %9, %cst_5 [0] : vector<16x128xf32> to vector<128xf32>
    %11 = vector.shape_cast %10 : vector<128xf32> to vector<1x128xf32>
    %cst_6 = arith.constant 6.250000e-02 : f32
    %12 = vector.broadcast %cst_6 : f32 to vector<1x128xf32>
    %13 = arith.mulf %11, %12 : vector<1x128xf32>
    %cst_7 = arith.constant 9.99999974E-6 : f32
    %14 = vector.broadcast %cst_7 : f32 to vector<1x128xf32>
    %15 = arith.addf %13, %14 : vector<1x128xf32>
    %16 = math.rsqrt %15 : vector<1x128xf32>
    %c0_8 = arith.constant 0 : index
    %c0_9 = arith.constant 0 : index
    %17 = vector.load %arg3[%c0_8, %c0_9] : memref<2x128xf32, #tpu.memory_space<vmem>>, vector<1x128xf32>
    %18 = arith.mulf %16, %17 : vector<1x128xf32>
    %19 = vector.broadcast %18 : vector<1x128xf32> to vector<16x128xf32>
    %20 = arith.mulf %8, %19 : vector<16x128xf32>
    %c1 = arith.constant 1 : index
    %c0_10 = arith.constant 0 : index
    %21 = vector.load %arg3[%c1, %c0_10] : memref<2x128xf32, #tpu.memory_space<vmem>>, vector<1x128xf32>
    %22 = vector.broadcast %21 : vector<1x128xf32> to vector<16x128xf32>
    %23 = arith.addf %20, %22 : vector<16x128xf32>
    %c128_i32 = arith.constant 128 : i32
    %24 = arith.muli %arg0, %c128_i32 : i32
    %25 = tpu.assume_multiple %24, 128 : i32
    %c0_11 = arith.constant 0 : index
    %26 = arith.index_cast %25 : i32 to index
    %27 = vector.load %arg1[%c0_11, %26] : memref<16x256xf32, #tpu.memory_space<vmem>>, vector<16x128xf32>
    %cst_12 = arith.constant 0.000000e+00 : f32
    %28 = vector.broadcast %cst_12 : f32 to vector<16x128xf32>
    %29 = arith.subf %28, %23 : vector<16x128xf32>
    %30 = math.exp %29 : vector<16x128xf32>
    %cst_13 = arith.constant 1.000000e+00 : f32
    %31 = vector.broadcast %cst_13 : f32 to vector<16x128xf32>
    %32 = arith.addf %31, %30 : vector<16x128xf32>
    %cst_14 = arith.constant 1.000000e+00 : f32
    %33 = vector.broadcast %cst_14 : f32 to vector<16x128xf32>
    %34 = arith.divf %33, %32 : vector<16x128xf32>
    %35 = arith.mulf %27, %34 : vector<16x128xf32>
    %c0_15 = arith.constant 0 : index
    %c0_16 = arith.constant 0 : index
    %36 = vector.load %arg4[%c0_15, %c0_16] : memref<16x128xf32, #tpu.memory_space<vmem>>, vector<16x128xf32>
    tpu.vector_store %arg4[%c0_15, %c0_16], %35 {strides = array<i32>} : memref<16x128xf32, #tpu.memory_space<vmem>>, vector<16x128xf32>,
    return
  }
  func.func @transform_0(%arg0: i32) -> (i32, i32) {
    %c0_i32 = arith.constant 0 : i32
    %c0_i32_0 = arith.constant 0 : i32
    %c0_i32_1 = arith.constant 0 : i32
    return %c0_i32, %c0_i32_0 : i32, i32
  }
  func.func @transform_1(%arg0: i32) -> (i32, i32) {
    %c0_i32 = arith.constant 0 : i32
    %c0_i32_0 = arith.constant 0 : i32
    return %c0_i32, %arg0 : i32, i32
  }
  func.func @transform_2(%arg0: i32) -> (i32, i32) {
    %c0_i32 = arith.constant 0 : i32
    %c0_i32_0 = arith.constant 0 : i32
    return %c0_i32, %arg0 : i32, i32
  }
  func.func @transform_3(%arg0: i32) -> (i32, i32) {
    %c0_i32 = arith.constant 0 : i32
    %c0_i32_0 = arith.constant 0 : i32
    return %c0_i32, %arg0 : i32, i32
  }
}

module attributes {stable_mosaic.version = 11 : i64} {
  func.func @kernel(%arg0: i32, %arg1: memref<16x256xf32, #tpu.memory_space<vmem>>, %arg2: memref<16x128xf32, #tpu.memory_space<vmem>>, %arg3: memref<256x128xf32, #tpu.memory_space<vmem>>, %arg4: memref<2x128xf32, #tpu.memory_space<vmem>>, %arg5: memref<16x128xf32, #tpu.memory_space<vmem>>) attributes {dimension_semantics = [#tpu.dimension_semantics<parallel>], iteration_bounds = array<i64: 2>, scalar_prefetch = 0 : i64, scratch_operands = 0 : i64, tpu.core_type = #tpu.core_type<tc>, window_params = [{pipeline_mode = #tpu.pipeline_mode<synchronous>, transform_indices = @transform_0, window_bounds = array<i64: 16, 256>}, {transform_indices = @transform_1, window_bounds = array<i64: 16, 128>}, {transform_indices = @transform_2, window_bounds = array<i64: 256, 128>}, {transform_indices = @transform_3, window_bounds = array<i64: 2, 128>}, {transform_indices = @transform_4, window_bounds = array<i64: 16, 128>}]} {
    %c0 = arith.constant 0 : index
    %c0_0 = arith.constant 0 : index
    %0 = vector.load %arg1[%c0, %c0_0] : memref<16x256xf32, #tpu.memory_space<vmem>>, vector<16x256xf32>
    %c0_1 = arith.constant 0 : index
    %c0_2 = arith.constant 0 : index
    %1 = vector.load %arg3[%c0_1, %c0_2] : memref<256x128xf32, #tpu.memory_space<vmem>>, vector<256x128xf32>
    %cst = arith.constant dense<0.000000e+00> : vector<16x128xf32>
    %2 = tpu.matmul %0, %1, %cst {dimension_numbers = #tpu.dot_dimension_numbers<[1], [0], [0], [1], [0, 0, 1, 1], [], []>} : vector<16x256xf32>, vector<256x128xf32>, vector<16x128xf32> -> vector<16x128xf32>
    %cst_3 = arith.constant dense<0.000000e+00> : vector<128xf32>
    %3 = vector.multi_reduction <add>, %2, %cst_3 [0] : vector<16x128xf32> to vector<128xf32>
    %4 = vector.shape_cast %3 : vector<128xf32> to vector<1x128xf32>
    %cst_4 = arith.constant 6.250000e-02 : f32
    %5 = vector.broadcast %cst_4 : f32 to vector<1x128xf32>
    %6 = arith.mulf %4, %5 : vector<1x128xf32>
    %7 = vector.broadcast %6 : vector<1x128xf32> to vector<16x128xf32>
    %8 = arith.subf %2, %7 : vector<16x128xf32>
    %9 = arith.mulf %8, %8 : vector<16x128xf32>
    %cst_5 = arith.constant dense<0.000000e+00> : vector<128xf32>
    %10 = vector.multi_reduction <add>, %9, %cst_5 [0] : vector<16x128xf32> to vector<128xf32>
    %11 = vector.shape_cast %10 : vector<128xf32> to vector<1x128xf32>
    %cst_6 = arith.constant 6.250000e-02 : f32
    %12 = vector.broadcast %cst_6 : f32 to vector<1x128xf32>
    %13 = arith.mulf %11, %12 : vector<1x128xf32>
    %cst_7 = arith.constant 9.99999974E-6 : f32
    %14 = vector.broadcast %cst_7 : f32 to vector<1x128xf32>
    %15 = arith.addf %13, %14 : vector<1x128xf32>
    %16 = math.rsqrt %15 : vector<1x128xf32>
    %c0_8 = arith.constant 0 : index
    %c0_9 = arith.constant 0 : index
    %17 = vector.load %arg4[%c0_8, %c0_9] : memref<2x128xf32, #tpu.memory_space<vmem>>, vector<1x128xf32>
    %18 = arith.mulf %16, %17 : vector<1x128xf32>
    %19 = vector.broadcast %18 : vector<1x128xf32> to vector<16x128xf32>
    %20 = arith.mulf %8, %19 : vector<16x128xf32>
    %c1 = arith.constant 1 : index
    %c0_10 = arith.constant 0 : index
    %21 = vector.load %arg4[%c1, %c0_10] : memref<2x128xf32, #tpu.memory_space<vmem>>, vector<1x128xf32>
    %22 = vector.broadcast %21 : vector<1x128xf32> to vector<16x128xf32>
    %23 = arith.addf %20, %22 : vector<16x128xf32>
    %c0_11 = arith.constant 0 : index
    %c0_12 = arith.constant 0 : index
    %24 = vector.load %arg2[%c0_11, %c0_12] : memref<16x128xf32, #tpu.memory_space<vmem>>, vector<16x128xf32>
    %cst_13 = arith.constant 0.000000e+00 : f32
    %25 = vector.broadcast %cst_13 : f32 to vector<16x128xf32>
    %26 = arith.subf %25, %23 : vector<16x128xf32>
    %27 = math.exp %26 : vector<16x128xf32>
    %cst_14 = arith.constant 1.000000e+00 : f32
    %28 = vector.broadcast %cst_14 : f32 to vector<16x128xf32>
    %29 = arith.addf %28, %27 : vector<16x128xf32>
    %cst_15 = arith.constant 1.000000e+00 : f32
    %30 = vector.broadcast %cst_15 : f32 to vector<16x128xf32>
    %31 = arith.divf %30, %29 : vector<16x128xf32>
    %32 = arith.mulf %24, %31 : vector<16x128xf32>
    %c0_16 = arith.constant 0 : index
    %c0_17 = arith.constant 0 : index
    %33 = vector.load %arg5[%c0_16, %c0_17] : memref<16x128xf32, #tpu.memory_space<vmem>>, vector<16x128xf32>
    tpu.vector_store %arg5[%c0_16, %c0_17], %32 {strides = array<i32>} : memref<16x128xf32, #tpu.memory_space<vmem>>, vector<16x128xf32>,
    return
  }
  func.func @transform_0(%arg0: i32) -> (i32, i32) {
    %c0_i32 = arith.constant 0 : i32
    %c0_i32_0 = arith.constant 0 : i32
    %c0_i32_1 = arith.constant 0 : i32
    return %c0_i32, %c0_i32_0 : i32, i32
  }
  func.func @transform_1(%arg0: i32) -> (i32, i32) {
    %c0_i32 = arith.constant 0 : i32
    %c0_i32_0 = arith.constant 0 : i32
    return %c0_i32, %arg0 : i32, i32
  }
  func.func @transform_2(%arg0: i32) -> (i32, i32) {
    %c0_i32 = arith.constant 0 : i32
    %c0_i32_0 = arith.constant 0 : i32
    return %c0_i32, %arg0 : i32, i32
  }
  func.func @transform_3(%arg0: i32) -> (i32, i32) {
    %c0_i32 = arith.constant 0 : i32
    %c0_i32_0 = arith.constant 0 : i32
    return %c0_i32, %arg0 : i32, i32
  }
  func.func @transform_4(%arg0: i32) -> (i32, i32) {
    %c0_i32 = arith.constant 0 : i32
    %c0_i32_0 = arith.constant 0 : i32
    return %c0_i32, %arg0 : i32, i32
  }
}

</mosaic_0001>

<bundles_post_ra>
// kernel: tpu_custom_call.1
= control target key start
LH: loop header
LB: loop body
LE: loop exit
PB: predicated region body
PF: predicated region fallthrough
CT: control target
= control target key end

     0   :  { %8 = vsyncpa [#allocation3], 0  ;;  %s1142_s0 = inlined_call_operand.hbm [shape: f32[16,256], index: 0, kind: input, shape index: {}]   ;;  %s1143_s1 = inlined_call_operand.hbm [shape: f32[256,256], index: 1, kind: input, shape index: {}]   ;;  %s1144_s2 = inlined_call_operand.hbm [shape: f32[2,256], index: 2, kind: input, shape index: {}]   ;;  %s1145_s3 = inlined_call_operand.hbm [shape: f32[16,256], index: 3, kind: output, shape index: {}]  }
   0x1   :  { %9 = vsyncpa [#allocation6], 0 }
   0x2   :  { %11 = vsyncpa [#allocation6 + $0x1], 0 }
   0x3   :  { %12 = vsyncpa [#allocation4], 0 }
   0x4   :  { %14 = vsyncpa [#allocation4 + $0x1], 0  ;;  %s880_s12 = smov 0   ;;  %s882_s13 = smov 0  }
   0x5   :  { %s884_s14 = smov 0   ;;  %s886_s15 = smov 0  }
   0x6 LB: > { %s901_s16 = sadd.s32 1, %s847_s15   ;;  %s48_s17 = sadd.s32 1, %s843_s14  ;;  %s847_s15 = sphi %s886_s15, %s1167_s15   ;;  %s843_s14 = sphi %s884_s14, %s1166_s14   ;;  %s839_s13 = sphi %s882_s13, %s1165_s13   ;;  %s835_s12 = sphi %s880_s12, %s1164_s12  }
   0x7   : > { %s45_s18 = ssub.s32 %s847_s15, %s901_s16  ;;  %p55_p0 = scmp.ne.s32.totalorder %s843_s14, %s839_s13 }
   0x8   : > { %p46_p1 = scmp.eq.s32.totalorder %s45_s18, 0  ;;  %p56_p2 = scmp.eq.s32.totalorder %s847_s15, 0 }
   0x9   : > { %p644_p5 = scmp.lt.s32.totalorder %s847_s15, 2  ;;  %s150_s20 = sand.u32 1, %s847_s15  }
   0xa   : > { %s911_s19 = scalar_select %p46_p1, %s843_s14, %s48_s17  }
   0xb   : > { %p57_p4 = por %p56_p2, %p55_p0  ;;  %s152_s21 = sand.u32 1, %s843_s14  }
   0xc   : > { %s532_s22 = sshll.u32 %s152_s21, 8  ;;  %s533_s23 = sshll.u32 %s847_s15, 7 }
   0xd   : > { %s925_s26 = scalar_lea.hbm %s1143_s1, %s533_s23  ;;  %s154_s27 = scalar_lea.vmem [#allocation5], %s532_s22 }
   0xe   : > { %s160_s28 = sshll.u32 %s154_s27, 4  ;;  %p929_p6 = pnand %p644_p5, %p57_p4  ;;  %s927_s28 = int_to_ptr.vmem [resolvable:$true] %s160_s28 }
   0xf   : > { %s933_s30 = scalar_lea.sflag [#allocation6], %s150_s20  ;;  %s697_s4 = scalar_lea.hbm %s925_s26, 4096 }
  0x10   : > { %p698_p7 = scmp.ne.s32.totalorder %s925_s26, %s697_s4  ;;  %p1147_p8 = pneg %p929_p6 }
  0x11   : > { %s702_s7 = scalar_lea.hbm %s1143_s1, 8192  ;;  %p703_p11 = scmp.lt.s32.totalorder %s925_s26, %s1143_s1 }
  0x12   : > { %p700_p9 = pnand %p1147_p8, %p698_p7  ;;  %p704_p12 = scmp.lt.s32.totalorder %s702_s7, %s697_s4 }
  0x14   : > { %p701_p10 = pneg %p700_p9  ;;  %p705_p13 = por %p704_p12, %p703_p11 }
  0x16   : > { %p706_p1 = pnand %p705_p13, %p701_p10 }
  0x18   : > { %709 = shalt.err (!%p706_p1)
}
  0x19   : > { %s710_s10 = scalar_lea.vmem %s927_s28, 4096  ;;  %s849_s11 = smov [#allocation5]  }
  0x1a   : > { %p711_p2 = scmp.ne.s32.totalorder %s927_s28, %s710_s10  ;;  %s715_s17 = sshll.u32 %s849_s11, 4  ;;  %s716_s17 = int_to_ptr.vmem [resolvable:$false] %s715_s17 }
  0x1b   : > { %s717_s18 = scalar_lea.vmem %s716_s17, 8192  ;;  %p718_p7 = scmp.lt.s32.totalorder %s927_s28, %s716_s17 }
  0x1c   : > { %p713_p4 = pnand %p711_p2, %p1147_p8  ;;  %p719_p9 = scmp.lt.s32.totalorder %s717_s18, %s710_s10 }
  0x1e   : > { %p714_p5 = pneg %p713_p4  ;;  %p720_p3 = por %p719_p9, %p718_p7 }
  0x20   : > { %p721_p11 = pnand %p720_p3, %p714_p5 }
  0x22   : > { %724 = shalt.err (!%p721_p11)
}
  0x23   : > { %s850_s20 = smov 256   ;;  %s851_s22 = smov 128  }
  0x24   : > { %s852_s23 = smov 8   ;;  %s962_s24 = sadd.s32 4294967295, %s847_s15  }
  0x25   : > { %635 = dma.hbm_to_vmem [thread:$0]  (!%p929_p6), %s925_s26, 4096, %s927_s28, %s933_s30, %s850_s20, %s851_s22, %s852_s23  }
  0x26   : > { %s528_s25 = sadd.s32 4294967294, %s847_s15   ;;  %p61_p3 = scmp.ne.s32.totalorder %s839_s13, %s835_s12 }
  0x27   : > { %p1146_p10 = scmp.eq.s32.totalorder %s962_s24, 0  ;;  %p111_p12 = scmp.eq.s32.totalorder %s962_s24, 1 }
  0x28   : > { %p117_p13 = scmp.eq.s32.totalorder %s528_s25, 1  ;;  %p529_p1 = scmp.ge.s32.totalorder %s847_s15, 1 }
  0x29   : > { %p972_p2 = por %p1146_p10, %p61_p3  ;;  %p979_p4 = por %p111_p12, %p55_p0 }
  0x2a   : > { %p983_p5 = por %p117_p13, %p61_p3  ;;  %p124_p7 = scmp.lt.s32.totalorder %s847_s15, 3 }
  0x2b   : > { %s1151_s27 = scalar_select %p972_p2, 1, 0 }
  0x2c   : > { %s1152_s26 = scalar_select %p979_p4, 1, 0 }
  0x2d   : > { %s1153_s28 = scalar_select %p983_p5, 1, 0 }
  0x2e   : > { %p988_p9 = pnand %p529_p1, %p124_p7  ;;  %s853_s5 = smov [#allocation2]  }
  0x2f   : > { %s136_s6 = sshll.u32 %s853_s5, 4  ;;  %s534_s7 = sshll.u32 %s152_s21, 1  ;;  %s137_s6 = int_to_ptr.vmem [resolvable:$true] %s136_s6 }
  0x30   : > { %p628_p11 = pneg %p988_p9  ;;  %s535_s8 = sshll.u32 %s847_s15, 5 }
  0x31   : > { %s1006_s17 = scalar_lea.hbm %s1144_s2, %s535_s8  ;;  %s174_s18 = scalar_lea.vmem [#allocation7], %s534_s7 }
  0x32   : > { %p999_p0 = pnand %p628_p11, %p1146_p10  ;;  %s181_s22 = sshll.u32 %s174_s18, 4  ;;  %s1008_s22 = int_to_ptr.vmem [resolvable:$true] %s181_s22 }
  0x33   : > { %s736_s23 = scalar_lea.vmem %s137_s6, 512  ;;  %p744_p7 = scmp.lt.s32.totalorder %s137_s6, %s137_s6 }
  0x34   : > { %p727_p3 = pneg %p999_p0  ;;  %p737_p12 = scmp.ne.s32.totalorder %s137_s6, %s736_s23 }
  0x35   : > { %p745_p11 = scmp.lt.s32.totalorder %s736_s23, %s736_s23 }
  0x36   : > { %p739_p13 = pnand %p737_p12, %p727_p3 }
  0x37   : > { %p746_p10 = por %p745_p11, %p744_p7 }
  0x38   : > { %p740_p1 = pneg %p739_p13 }
  0x3a   : > { %p747_p8 = pnand %p746_p10, %p740_p1 }
  0x3c   : > { %750 = shalt.err (!%p747_p8)
}
  0x3d   : > { %s854_s21 = smov 16   ;;  %s751_s7 = scalar_lea.hbm %s1006_s17, 32 }
  0x3e   : > { %631 = dma.hbm_to_vmem [thread:$0]  (!%p999_p0), %s1142_s0, 512, %s137_s6, [#allocation3], %s850_s20, %s850_s20, %s854_s21  }
  0x3f   : > { %p752_p3 = scmp.ne.s32.totalorder %s1006_s17, %s751_s7  ;;  %p1156_p12 = pneg %p929_p6 }
  0x40   : > { %s756_s9 = scalar_lea.hbm %s1144_s2, 64  ;;  %p757_p8 = scmp.lt.s32.totalorder %s1006_s17, %s1144_s2 }
  0x41   : > { %p754_p13 = pnand %p752_p3, %p1156_p12  ;;  %p758_p1 = scmp.lt.s32.totalorder %s756_s9, %s751_s7 }
  0x43   : > { %p755_p10 = pneg %p754_p13  ;;  %p759_p7 = por %p758_p1, %p757_p8 }
  0x45   : > { %p760_p11 = pnand %p759_p7, %p755_p10 }
  0x47   : > { %763 = shalt.err (!%p760_p11)
}
  0x48   : > { %s764_s20 = scalar_lea.vmem %s1008_s22, 32  ;;  %p1157_p3 = pmov %p1156_p12 }
  0x49   : > { %p765_p0 = scmp.ne.s32.totalorder %s1008_s22, %s764_s20  ;;  %s855_s6 = smov [#allocation7]  }
  0x4a   : > { %s769_s23 = sshll.u32 %s855_s6, 4  ;;  %s770_s23 = int_to_ptr.vmem [resolvable:$false] %s769_s23 }
  0x4b   : > { %p767_p12 = pnand %p765_p0, %p1157_p3  ;;  %s771_s21 = scalar_lea.vmem %s770_s23, 64 }
  0x4c   : > { %p772_p5 = scmp.lt.s32.totalorder %s1008_s22, %s770_s23  ;;  %p773_p4 = scmp.lt.s32.totalorder %s771_s21, %s764_s20 }
  0x4d   : > { %p768_p13 = pneg %p767_p12 }
  0x4e   : > { %p774_p2 = por %p773_p4, %p772_p5 }
  0x50   : > { %p775_p8 = pnand %p774_p2, %p768_p13 }
  0x52   : > { %778 = shalt.err (!%p775_p8)
}
  0x53   : > { %638 = dma.hbm_to_vmem [thread:$0]  (!%p929_p6), %s1006_s17, 32, %s1008_s22, %s933_s30  }
  0x54   : > { %190 = sbr.rel (%p988_p9) target bundleno = 438 (0x1b6), region = 32  ;;  %p1158_p10 = scmp.eq.s32.totalorder (!%p988_p9), %s962_s24, 0 }
  0x59   : > { %822 = dma.done.wait (%p1158_p10), [#allocation3], 512   ;;  %p1159_p1 = pmov %p1158_p10 }
  0x5a   : > { %s196_s25 = sand.u32 1, %s962_s24   ;;  %s1050_s5 = sand.u32 1, %s839_s13  }
  0x5b   : > { %824 = vsyncadd (%p1159_p1), [#allocation3], 4294966784  ;;  %s538_s29 = sshll.u32 %s1050_s5, 8  ;;  %s197_s7 = scalar_lea.sflag [#allocation6], %s196_s25 }
  0x5c   : > { %s1053_s8 = scalar_lea.vmem [#allocation5], %s538_s29  ;;  %p1160_p6 = scmp.ne.s32.totalorder %s1151_s27, 0 }
  0x5e   : > { %826 = dma.done.wait (%p1160_p6), %s197_s7, 4128  }
  0x5f   : > { %828 = vsyncadd (%p1160_p6), %s197_s7, 4294963168  ;;  %v272_v0 = vld [vmem:[%s1053_s8 + $0xf8] sm:$0xff]  ;;  %v271_v2 = vld [vmem:[%s1053_s8 + $0xf0] sm:$0xff]  ;;  %v372_v63 = vlaneseq  ;;  %s539_s30 = sshll.u32 %s1050_s5, 1  ;;  %s542_s4 = sshll.u32 %s962_s24, 7 }
  0x60   : > { %v256_v1 = vld [vmem:[%s1053_s8 + $0x78] sm:$0xff]  ;;  %548 = vmatprep.subr.mxu0 %v272_v0  ;;  %586 = vmatprep.subr.mxu1 %v272_v0  ;;  %v255_v3 = vld [vmem:[%s1053_s8 + $0x70] sm:$0xff]  ;;  %v270_v4 = vld [vmem:[%s1053_s8 + $0xe8] sm:$0xff]  ;;  %s209_s27 = scalar_lea.vmem [#allocation7], %s539_s30  ;;  %s386_s17 = sshra.s32 %s542_s4, 7 }
  0x61   : > { %549 = vmatpush3.msra.mxu0 %v256_v1  ;;  %602 = vmatpush3.msra.mxu1 %v256_v1  ;;  %v254_v5 = vld [vmem:[%s1053_s8 + $0x68] sm:$0xff]  ;;  %v269_v6 = vld [vmem:[%s1053_s8 + $0xe0] sm:$0xff]  ;;  %v268_v8 = vld [vmem:[%s1053_s8 + $0xd8] sm:$0xff]  ;;  %v373_v0 = vshrl.u32 %v372_v63, 7  ;;  %s540_s22 = sshll.u32 %s1050_s5, 4  ;;  %s543_s10 = sshll.u32 %s386_s17, 3 }
  0x62   : > { %550 = vmatprep.subr.mxu0 %v271_v2  ;;  %587 = vmatprep.subr.mxu1 %v271_v2  ;;  %v253_v7 = vld [vmem:[%s1053_s8 + $0x60] sm:$0xff]  ;;  %v252_v9 = vld [vmem:[%s1053_s8 + $0x58] sm:$0xff]  ;;  %v267_v10 = vld [vmem:[%s1053_s8 + $0xd0] sm:$0xff]  ;;  %s389_s9 = scalar_lea.vmem [#allocation2], %s543_s10  ;;  %s236_s11 = scalar_lea.vmem [#allocation8], %s540_s22 }
  0x63   : > { %551 = vmatpush3.msra.mxu0 %v255_v3  ;;  %603 = vmatpush3.msra.mxu1 %v255_v3  ;;  %v251_v11 = vld [vmem:[%s1053_s8 + $0x50] sm:$0xff]  ;;  %v266_v12 = vld [vmem:[%s1053_s8 + $0xc8] sm:$0xff]  ;;  %v265_v14 = vld [vmem:[%s1053_s8 + $0xc0] sm:$0xff]  ;;  %v374_v2 = vsub.s32 0, %v373_v0  ;;  %s421_s18 = sshll.u32 %s236_s11, 4  ;;  %s1097_s23 = scalar_lea.hbm %s1145_s3, %s542_s4  ;;  %s1099_s18 = int_to_ptr.vmem [resolvable:$true] %s421_s18 }
  0x64   : > { %552 = vmatprep.subr.mxu0 %v270_v4  ;;  %588 = vmatprep.subr.mxu1 %v270_v4  ;;  %v250_v13 = vld [vmem:[%s1053_s8 + $0x48] sm:$0xff]  ;;  %v249_v15 = vld [vmem:[%s1053_s8 + $0x40] sm:$0xff]  ;;  %v264_v16 = vld [vmem:[%s1053_s8 + $0xb8] sm:$0xff]  ;;  %s409_s24 = scalar_lea.sflag [#allocation4], %s1050_s5  ;;  %s779_s21 = scalar_lea.vmem %s1099_s18, 256 }
  0x65   : > { %553 = vmatpush3.msra.mxu0 %v254_v5  ;;  %604 = vmatpush3.msra.mxu1 %v254_v5  ;;  %v248_v17 = vld [vmem:[%s1053_s8 + $0x38] sm:$0xff]  ;;  %v263_v18 = vld [vmem:[%s1053_s8 + $0xb0] sm:$0xff]  ;;  %v262_v20 = vld [vmem:[%s1053_s8 + $0xa8] sm:$0xff]  ;;  %p780_p2 = scmp.ne.s32.totalorder %s1099_s18, %s779_s21  ;;  %p1161_p4 = scmp.ne.s32.totalorder %s1152_s26, 0 }
  0x66   : > { %554 = vmatprep.subr.mxu0 %v269_v6  ;;  %589 = vmatprep.subr.mxu1 %v269_v6  ;;  %v247_v19 = vld [vmem:[%s1053_s8 + $0x30] sm:$0xff]  ;;  %v246_v21 = vld [vmem:[%s1053_s8 + $0x28] sm:$0xff]  ;;  %v261_v22 = vld [vmem:[%s1053_s8 + $0xa0] sm:$0xff]  ;;  %s856_s25 = smov [#allocation8]  }
  0x67   : > { %555 = vmatpush3.msra.mxu0 %v253_v7  ;;  %605 = vmatpush3.msra.mxu1 %v253_v7  ;;  %v245_v23 = vld [vmem:[%s1053_s8 + $0x20] sm:$0xff]  ;;  %v260_v24 = vld [vmem:[%s1053_s8 + $0x98] sm:$0xff]  ;;  %v259_v26 = vld [vmem:[%s1053_s8 + $0x90] sm:$0xff]  ;;  %p781_p5 = pnand %p780_p2, %p1161_p4  ;;  %s783_s29 = sshll.u32 %s856_s25, 4  ;;  %s784_s29 = int_to_ptr.vmem [resolvable:$false] %s783_s29 }
  0x68   : > { %556 = vmatprep.subr.mxu0 %v268_v8  ;;  %590 = vmatprep.subr.mxu1 %v268_v8  ;;  %v244_v25 = vld [vmem:[%s1053_s8 + $0x18] sm:$0xff]  ;;  %v243_v27 = vld [vmem:[%s1053_s8 + $0x10] sm:$0xff]  ;;  %v258_v28 = vld [vmem:[%s1053_s8 + $0x88] sm:$0xff]  ;;  %s785_s7 = scalar_lea.vmem %s784_s29, 512  ;;  %p786_p7 = scmp.lt.s32.totalorder %s1099_s18, %s784_s29 }
  0x69   : > { %557 = vmatpush3.msra.mxu0 %v252_v9  ;;  %606 = vmatpush3.msra.mxu1 %v252_v9  ;;  %v242_v29 = vld [vmem:[%s1053_s8 + $0x8] sm:$0xff]  ;;  %v257_v30 = vld [vmem:[%s1053_s8 + $0x80] sm:$0xff]  ;;  %v240_v33 = vld [vmem:[#allocation2 + $0x18] sm:$0xff]  ;;  %p782_p9 = pneg %p781_p5  ;;  %p787_p11 = scmp.lt.s32.totalorder %s785_s7, %s779_s21 }
  0x6a   : > { %558 = vmatprep.subr.mxu0 %v267_v10  ;;  %591 = vmatprep.subr.mxu1 %v267_v10  ;;  %v241_v31 = vld [vmem:[%s1053_s8] sm:$0xff]  ;;  %v238_v32 = vld [vmem:[#allocation2 + $0x8] sm:$0xff]  ;;  %v239_v35 = vld [vmem:[#allocation2 + $0x10] sm:$0xff] }
  0x6b   : > { %559 = vmatpush3.msra.mxu0 %v251_v11  ;;  %607 = vmatpush3.msra.mxu1 %v251_v11  ;;  %v237_v34 = vld [vmem:[#allocation2] sm:$0xff]  ;;  %p788_p0 = por %p787_p11, %p786_p7 }
  0x6c   : > { %560 = vmatprep.subr.mxu0 %v266_v12  ;;  %592 = vmatprep.subr.mxu1 %v266_v12  ;;  %v370_v1 = vld [vmem:[%s209_s27] sm:$0x1]  ;;  %v541_v6 = vld [vmem:[%s209_s27 + $0x1] ss:$0 sm:$0xff] }
  0x6d   : > { %561 = vmatpush3.msra.mxu0 %v250_v13  ;;  %608 = vmatpush3.msra.mxu1 %v250_v13  ;;  %p789_p3 = pnand %p788_p0, %p782_p9 }
  0x6e   : > { %562 = vmatprep.subr.mxu0 %v265_v14  ;;  %593 = vmatprep.subr.mxu1 %v265_v14 }
  0x6f   : > { %563 = vmatpush3.msra.mxu0 %v249_v15  ;;  %609 = vmatpush3.msra.mxu1 %v249_v15 }
  0x70   : > { %564 = vmatprep.subr.mxu0 %v264_v16  ;;  %594 = vmatprep.subr.mxu1 %v264_v16 }
  0x71   : > { %565 = vmatpush3.msra.mxu0 %v248_v17  ;;  %610 = vmatpush3.msra.mxu1 %v248_v17 }
  0x72   : > { %566 = vmatprep.subr.mxu0 %v263_v18  ;;  %595 = vmatprep.subr.mxu1 %v263_v18 }
  0x73   : > { %567 = vmatpush3.msra.mxu0 %v247_v19  ;;  %611 = vmatpush3.msra.mxu1 %v247_v19  ;;  %v390_v19 = vld [vmem:[%s389_s9] sm:$0xff] }
  0x74   : > { %568 = vmatprep.subr.mxu0 %v262_v20  ;;  %596 = vmatprep.subr.mxu1 %v262_v20  ;;  %v391_v20 = vld [vmem:[%s389_s9 + $0x10] sm:$0xff] }
  0x75   : > { %569 = vmatpush3.msra.mxu0 %v246_v21  ;;  %612 = vmatpush3.msra.mxu1 %v246_v21 }
  0x76   : > { %570 = vmatprep.subr.mxu0 %v261_v22  ;;  %597 = vmatprep.subr.mxu1 %v261_v22 }
  0x77   : > { %571 = vmatpush3.msra.mxu0 %v245_v23  ;;  %613 = vmatpush3.msra.mxu1 %v245_v23 }
  0x78   : > { %572 = vmatprep.subr.mxu0 %v260_v24  ;;  %598 = vmatprep.subr.mxu1 %v260_v24 }
  0x79   : > { %573 = vmatpush3.msra.mxu0 %v244_v25  ;;  %614 = vmatpush3.msra.mxu1 %v244_v25 }
  0x7a   : > { %574 = vmatprep.subr.mxu0 %v259_v26  ;;  %599 = vmatprep.subr.mxu1 %v259_v26 }
  0x7b   : > { %575 = vmatpush3.msra.mxu0 %v243_v27  ;;  %615 = vmatpush3.msra.mxu1 %v243_v27 }
  0x7c   : > { %576 = vmatprep.subr.mxu0 %v258_v28  ;;  %600 = vmatprep.subr.mxu1 %v258_v28 }
  0x7d   : > { %577 = vmatpush3.msra.mxu0 %v242_v29  ;;  %616 = vmatpush3.msra.mxu1 %v242_v29 }
  0x7e   : > { %578 = vmatprep.subr.mxu0 %v257_v30  ;;  %601 = vmatprep.subr.mxu1 %v257_v30 }
  0x7f   : > { %579 = vmatpush3.msra.mxu0 %v241_v31  ;;  %617 = vmatpush3.msra.mxu1 %v241_v31 }
  0x80   : > { %337 = vmatprep.mubr.f32.mxu0 %v238_v32  ;;  %342 = vmatprep.mubr.f32.mxu1 %v240_v33 }
  0x81   : > { %338 = vmatmul.mubr.f32.vlgmr.msra.gmra.mxu0 %v237_v34  ;;  %343 = vmatmul.mubr.f32.vlgmr.msra.gmra.mxu1 %v239_v35 }
 0x141   : > { %v580_v36 = vpop.f32.mrf.mxu0  ;;  %v583_v37 = vpop.f32.mrf.mxu1 }
 0x143   : > { %v581_v38 = vpop.f32.mrf.mxu0  ;;  %v584_v39 = vpop.f32.mrf.mxu1 }
 0x144   : > { %v582_v40 = vadd.f32 %v581_v38, %v580_v36  ;;  %v585_v41 = vadd.f32 %v584_v39, %v583_v37 }
 0x146   : > { %v348_v42 = vadd.f32 %v585_v41, %v582_v40 }
 0x148   : > { %v349_v43 = vrot.slane %v348_v42, 4 }
 0x14a   : > { %v350_v44 = vadd.f32 %v349_v43, %v348_v42 }
 0x14c   : > { %v351_v45 = vrot.slane %v350_v44, 2 }
 0x14e   : > { %v352_v46 = vadd.f32 %v351_v45, %v350_v44 }
 0x150   : > { %v353_v47 = vrot.slane %v352_v46, 1 }
 0x152   : > { %v354_v48 = vadd.f32 %v353_v47, %v352_v46 }
 0x154   : > { %v355_v49 = vmul.f32 0.0625, %v354_v48 }
 0x156   : > { %v356_v50 = vsub.f32 %v582_v40, %v355_v49  ;;  %v357_v51 = vsub.f32 %v585_v41, %v355_v49 }
 0x158   : > { %v358_v52 = vmul.f32 %v356_v50, %v356_v50  ;;  %v359_v53 = vmul.f32 %v357_v51, %v357_v51 }
 0x15a   : > { %v360_v54 = vadd.f32 %v359_v53, %v358_v52 }
 0x15c   : > { %v361_v55 = vrot.slane %v360_v54, 4 }
 0x15e   : > { %v362_v56 = vadd.f32 %v361_v55, %v360_v54 }
 0x160   : > { %v363_v57 = vrot.slane %v362_v56, 2 }
 0x162   : > { %v364_v58 = vadd.f32 %v363_v57, %v362_v56 }
 0x164   : > { %v365_v59 = vrot.slane %v364_v58, 1 }
 0x166   : > { %v366_v60 = vadd.f32 %v365_v59, %v364_v58 }
 0x168   : > { %v367_v61 = vmul.f32 0.0625, %v366_v60 }
 0x16a   : > { %v368_v62 = vadd.f32 1e-05, %v367_v61 }
 0x16c   : > { %687 = vrsqrt.f32 %v368_v62 }
 0x179   : > { %v688_v3 = vpop.eup %687 }
 0x17a   : > { %v371_v4 = vmul.f32 %v688_v3, %v370_v1 }
 0x17c   : > { %v375_v5 = vrot.slane %v371_v4, %v374_v2 }
 0x17e   : > { %v376_v7 = vmul.f32 %v375_v5, %v356_v50  ;;  %v377_v8 = vmul.f32 %v375_v5, %v357_v51 }
 0x180   : > { %v383_v9 = vadd.f32 %v541_v6, %v376_v7  ;;  %v384_v10 = vadd.f32 %v541_v6, %v377_v8 }
 0x182   : > { %v392_v11 = vsub.f32 0.0, %v383_v9  ;;  %v393_v12 = vsub.f32 0.0, %v384_v10 }
 0x184   : > { %v394_v13 = vmul.f32 1.442695, %v392_v11  ;;  %v396_v14 = vmul.f32 1.442695, %v393_v12 }
 0x186   : > { %689 = vpow2.f32 %v394_v13 }
 0x187   : > { %691 = vpow2.f32 %v396_v14 }
 0x193   : > { %v690_v15 = vpop.eup %689 }
 0x194   : > { %v692_v16 = vpop.eup %691  ;;  %v398_v17 = vadd.f32 1.0, %v690_v15 }
 0x195   : > { %v399_v18 = vadd.f32 1.0, %v692_v16 }
 0x196   : > { %693 = vrcp.f32 %v398_v17 }
 0x197   : > { %695 = vrcp.f32 %v399_v18 }
 0x1a3   : > { %v694_v21 = vpop.eup %693 }
 0x1a4   : > { %v696_v22 = vpop.eup %695  ;;  %v404_v23 = vmul.f32 %v694_v21, %v390_v19 }
 0x1a5   : > { %v405_v24 = vmul.f32 %v696_v22, %v391_v20 }
 0x1a6   : > { %406 = vst [vmem:[%s236_s11] sm:$0xff] %v404_v23 }
 0x1a7   : > { %407 = vst [vmem:[%s236_s11 + $0x8] sm:$0xff] %v405_v24 }
 0x1a8   : > { %792 = shalt.err (!%p789_p3)
}
 0x1a9   : > { %s793_s8 = scalar_lea.hbm %s1097_s23, 256  ;;  %s797_s4 = scalar_lea.hbm %s1145_s3, 512 }
 0x1aa   : > { %p794_p12 = scmp.ne.s32.totalorder %s1097_s23, %s793_s8  ;;  %p798_p10 = scmp.lt.s32.totalorder %s1097_s23, %s1145_s3 }
 0x1ab   : > { %p799_p1 = scmp.lt.s32.totalorder %s797_s4, %s793_s8 }
 0x1ac   : > { %p795_p13 = pnand %p794_p12, %p1161_p4 }
 0x1ad   : > { %p800_p6 = por %p799_p1, %p798_p10 }
 0x1ae   : > { %p796_p8 = pneg %p795_p13 }
 0x1b0   : > { %p801_p2 = pnand %p800_p6, %p796_p8 }
 0x1b2   : > { %804 = shalt.err (!%p801_p2)
}
 0x1b3   : > { %s857_s10 = smov 128   ;;  %s858_s9 = smov 256  }
 0x1b4   : > { %s859_s11 = smov 8  }
 0x1b5   : > { %626 = dma.vmem_to_hbm [thread:$0]  (%p1161_p4), %s1099_s18, 256, %s1097_s23, %s409_s24, %s857_s10, %s858_s9, %s859_s11  }
 0x1b6 PF: > { %s436_s20 = sand.u32 1, %s835_s12   ;;  %p1162_p5 = scmp.ne.s32.totalorder %s1153_s28, 0 }
 0x1b7   : > { %p1163_p9 = scmp.ge.s32.totalorder %s847_s15, 2  ;;  %s437_s6 = scalar_lea.sflag [#allocation4], %s436_s20 }
 0x1b9   : > { %p640_p7 = pnand %p1163_p9, %p1162_p5 }
 0x1bb   : > { %p641_p11 = pneg %p640_p7 }
 0x1bd   : > { %830 = dma.done.wait (%p641_p11), %s437_s6, 256  }
 0x1be   : > { %832 = vsyncadd (%p641_p11), %s437_s6, 4294967040  ;;  %p17_p0 = scmp.ge.s32.totalorder %s901_s16, 4   ;;  %s1164_s12 = smov %s839_s13 }
 0x1bf   : > { %s1165_s13 = smov %s843_s14  ;;  %s1166_s14 = smov %s911_s19 }
 0x1c0   : > { %s1167_s15 = smov %s901_s16  ;;  %19 = sbr.rel (!%p17_p0) target bundleno = 6 (0x6), region = 94 }
 0x1c5   :  { %442 = vsyncpa [#allocation3], 1 }
 0x1c6   :  { %444 = vsyncpa [#allocation3 + $0x1], 1 }
 0x1c7   :  { %445 = vsyncpa [#allocation6], 1 }
 0x1c8   :  { %447 = vsyncpa [#allocation6 + $0x1], 1 }
 0x1c9   :  { %448 = vsyncpa [#allocation4], 1 }
 0x1ca   :  { %450 = vsyncpa [#allocation4 + $0x1], 1 }

// kernel: tpu_custom_call.1
= control target key start
LH: loop header
LB: loop body
LE: loop exit
PB: predicated region body
PF: predicated region fallthrough
CT: control target
= control target key end

     0   :  { %9 = vsyncpa [#allocation3], 0  ;;  %s1214_s0 = inlined_call_operand.hbm [shape: f32[16,256], index: 0, kind: input, shape index: {}]   ;;  %s1215_s1 = inlined_call_operand.hbm [shape: f32[16,256], index: 1, kind: input, shape index: {}]   ;;  %s1216_s2 = inlined_call_operand.hbm [shape: f32[256,256], index: 2, kind: input, shape index: {}]   ;;  %s1217_s3 = inlined_call_operand.vmem [shape: f32[2,256], index: 3, kind: input, shape index: {}]   ;;  %s1218_s4 = inlined_call_operand.hbm [shape: f32[16,256], index: 4, kind: output, shape index: {}]  }
   0x1   :  { %10 = vsyncpa [#allocation6], 0 }
   0x2   :  { %12 = vsyncpa [#allocation6 + $0x1], 0 }
   0x3   :  { %13 = vsyncpa [#allocation4], 0 }
   0x4   :  { %15 = vsyncpa [#allocation4 + $0x1], 0  ;;  %s935_s15 = smov 0   ;;  %s937_s16 = smov 0  }
   0x5   :  { %s939_s17 = smov 0   ;;  %s941_s18 = smov 0  }
   0x6 LB: > { %s956_s19 = sadd.s32 1, %s897_s18   ;;  %s49_s20 = sadd.s32 1, %s893_s17  ;;  %s897_s18 = sphi %s941_s18, %s1241_s18   ;;  %s893_s17 = sphi %s939_s17, %s1240_s17   ;;  %s889_s16 = sphi %s937_s16, %s1239_s16   ;;  %s885_s15 = sphi %s935_s15, %s1238_s15  }
   0x7   : > { %s46_s21 = ssub.s32 %s897_s18, %s956_s19  ;;  %p56_p0 = scmp.ne.s32.totalorder %s893_s17, %s889_s16 }
   0x8   : > { %p47_p1 = scmp.eq.s32.totalorder %s46_s21, 0  ;;  %p57_p2 = scmp.eq.s32.totalorder %s897_s18, 0 }
   0x9   : > { %p694_p5 = scmp.lt.s32.totalorder %s897_s18, 2  ;;  %s177_s23 = sand.u32 1, %s897_s18  }
   0xa   : > { %s966_s22 = scalar_select %p47_p1, %s893_s17, %s49_s20  }
   0xb   : > { %p58_p4 = por %p57_p2, %p56_p0  ;;  %s179_s24 = sand.u32 1, %s893_s17  }
   0xc   : > { %s583_s25 = sshll.u32 %s179_s24, 4  ;;  %s584_s26 = sshll.u32 %s897_s18, 7 }
   0xd   : > { %s980_s29 = scalar_lea.hbm %s1215_s1, %s584_s26  ;;  %s181_s30 = scalar_lea.vmem [#allocation5], %s583_s25 }
   0xe   : > { %s187_s5 = sshll.u32 %s181_s30, 4  ;;  %p984_p6 = pnand %p694_p5, %p58_p4  ;;  %s982_s5 = int_to_ptr.vmem [resolvable:$true] %s187_s5 }
   0xf   : > { %s988_s7 = sshll.u32 %s179_s24, 8  ;;  %s990_s8 = scalar_lea.sflag [#allocation6], %s177_s23 }
  0x10   : > { %s747_s9 = scalar_lea.hbm %s980_s29, 256  ;;  %p749_p8 = pneg %p984_p6 }
  0x11   : > { %p748_p7 = scmp.ne.s32.totalorder %s980_s29, %s747_s9  ;;  %s752_s12 = scalar_lea.hbm %s1215_s1, 512 }
  0x12   : > { %p753_p11 = scmp.lt.s32.totalorder %s980_s29, %s1215_s1  ;;  %p754_p12 = scmp.lt.s32.totalorder %s752_s12, %s747_s9 }
  0x13   : > { %p750_p9 = pnand %p749_p8, %p748_p7 }
  0x14   : > { %p755_p13 = por %p754_p12, %p753_p11 }
  0x15   : > { %p751_p10 = pneg %p750_p9 }
  0x17   : > { %p756_p1 = pnand %p755_p13, %p751_p10 }
  0x19   : > { %759 = shalt.err (!%p756_p1)
}
  0x1a   : > { %s760_s20 = scalar_lea.vmem %s982_s5, 256  ;;  %s899_s21 = smov [#allocation5]  }
  0x1b   : > { %p761_p2 = scmp.ne.s32.totalorder %s982_s5, %s760_s20  ;;  %s765_s23 = sshll.u32 %s899_s21, 4  ;;  %s766_s23 = int_to_ptr.vmem [resolvable:$false] %s765_s23 }
  0x1c   : > { %s767_s24 = scalar_lea.vmem %s766_s23, 512  ;;  %p768_p7 = scmp.lt.s32.totalorder %s982_s5, %s766_s23 }
  0x1d   : > { %p763_p4 = pnand %p761_p2, %p749_p8  ;;  %p769_p9 = scmp.lt.s32.totalorder %s767_s24, %s760_s20 }
  0x1f   : > { %p764_p5 = pneg %p763_p4  ;;  %p770_p3 = por %p769_p9, %p768_p7 }
  0x21   : > { %p771_p11 = pnand %p770_p3, %p764_p5 }
  0x23   : > { %774 = shalt.err (!%p771_p11)
}
  0x24   : > { %s1220_s25 = smov 256   ;;  %s901_s27 = smov 128  }
  0x25   : > { %s902_s28 = smov 8   ;;  %s201_s30 = scalar_lea.vmem [#allocation7], %s988_s7 }
  0x26   : > { %685 = dma.hbm_to_vmem [thread:$0]  (!%p984_p6), %s980_s29, 256, %s982_s5, %s990_s8, %s1220_s25, %s901_s27, %s902_s28  }
  0x27   : > { %s207_s9 = sshll.u32 %s201_s30, 4  ;;  %s1022_s10 = sadd.s32 4294967295, %s897_s18   ;;  %s1055_s9 = int_to_ptr.vmem [resolvable:$true] %s207_s9 }
  0x28   : > { %s579_s11 = sadd.s32 4294967294, %s897_s18   ;;  %p62_p3 = scmp.ne.s32.totalorder %s889_s16, %s885_s15 }
  0x29   : > { %p1219_p10 = scmp.eq.s32.totalorder %s1022_s10, 0  ;;  %p138_p12 = scmp.eq.s32.totalorder %s1022_s10, 1 }
  0x2a   : > { %p144_p13 = scmp.eq.s32.totalorder %s579_s11, 1  ;;  %p580_p2 = scmp.ge.s32.totalorder %s897_s18, 1 }
  0x2b   : > { %p1031_p1 = por %p1219_p10, %p62_p3  ;;  %p1039_p4 = por %p138_p12, %p56_p0 }
  0x2c   : > { %p1043_p5 = por %p144_p13, %p62_p3  ;;  %p151_p7 = scmp.lt.s32.totalorder %s897_s18, 3 }
  0x2d   : > { %s1225_s12 = scalar_select %p1031_p1, 1, 0 }
  0x2e   : > { %s1226_s29 = scalar_select %p1039_p4, 1, 0 }
  0x2f   : > { %s1227_s5 = scalar_select %p1043_p5, 1, 0 }
  0x30   : > { %s1053_s14 = scalar_lea.hbm %s1216_s2, %s584_s26  ;;  %p1057_p0 = pnand %p580_p2, %p151_p7 }
  0x31   : > { %s903_s21 = smov [#allocation2]   ;;  %s775_s24 = scalar_lea.hbm %s1053_s14, 4096 }
  0x32   : > { %s1061_s23 = sshll.u32 %s903_s21, 4  ;;  %p776_p11 = scmp.ne.s32.totalorder %s1053_s14, %s775_s24  ;;  %s164_s23 = int_to_ptr.vmem [resolvable:$true] %s1061_s23 }
  0x33   : > { %s780_s11 = scalar_lea.hbm %s1216_s2, 8192  ;;  %p781_p13 = scmp.lt.s32.totalorder %s1053_s14, %s1216_s2 }
  0x34   : > { %p778_p3 = pnand %p776_p11, %p749_p8  ;;  %p782_p2 = scmp.lt.s32.totalorder %s780_s11, %s775_s24 }
  0x36   : > { %p779_p12 = pneg %p778_p3  ;;  %p783_p7 = por %p782_p2, %p781_p13 }
  0x38   : > { %p784_p10 = pnand %p783_p7, %p779_p12 }
  0x3a   : > { %787 = shalt.err (!%p784_p10)
}
  0x3b   : > { %s788_s21 = scalar_lea.vmem %s1055_s9, 4096  ;;  %s904_s26 = smov [#allocation7]  }
  0x3c   : > { %p789_p9 = scmp.ne.s32.totalorder %s1055_s9, %s788_s21  ;;  %s793_s30 = sshll.u32 %s904_s26, 4  ;;  %s794_s30 = int_to_ptr.vmem [resolvable:$false] %s793_s30 }
  0x3d   : > { %s795_s25 = scalar_lea.vmem %s794_s30, 8192  ;;  %p796_p5 = scmp.lt.s32.totalorder %s1055_s9, %s794_s30 }
  0x3e   : > { %p791_p11 = pnand %p789_p9, %p749_p8  ;;  %p797_p4 = scmp.lt.s32.totalorder %s795_s25, %s788_s21 }
  0x40   : > { %p792_p3 = pneg %p791_p11  ;;  %p798_p1 = por %p797_p4, %p796_p5 }
  0x42   : > { %p799_p13 = pnand %p798_p1, %p792_p3 }
  0x44   : > { %802 = shalt.err (!%p799_p13)
}
  0x45   : > { %s1229_s24 = smov 256   ;;  %p1230_p8 = scmp.eq.s32.totalorder %s1022_s10, 0 }
  0x46   : > { %688 = dma.hbm_to_vmem [thread:$0]  (!%p984_p6), %s1053_s14, 4096, %s1055_s9, %s990_s8, %s1229_s24, %s901_s27, %s902_s28  }
  0x47   : > { %p1231_p10 = pneg %p1057_p0  ;;  %s814_s25 = scalar_lea.vmem %s164_s23, 512 }
  0x48   : > { %p815_p1 = scmp.ne.s32.totalorder %s164_s23, %s814_s25  ;;  %p822_p2 = scmp.lt.s32.totalorder %s164_s23, %s164_s23 }
  0x49   : > { %p679_p9 = pnand %p1231_p10, %p1230_p8  ;;  %p823_p7 = scmp.lt.s32.totalorder %s814_s25, %s814_s25 }
  0x4b   : > { %p805_p4 = pneg %p679_p9  ;;  %p824_p11 = por %p823_p7, %p822_p2 }
  0x4d   : > { %p817_p5 = pnand %p815_p1, %p805_p4 }
  0x4f   : > { %p818_p12 = pneg %p817_p5 }
  0x51   : > { %p825_p3 = pnand %p824_p11, %p818_p12 }
  0x53   : > { %828 = shalt.err (!%p825_p3)
}
  0x54   : > { %s905_s6 = smov 16   ;;  %226 = sbr.rel (%p1057_p0) target bundleno = 439 (0x1b7), region = 36 }
  0x55   : > { %681 = dma.hbm_to_vmem [thread:$0]  (!%p679_p9), %s1214_s0, 512, %s164_s23, [#allocation3], %s1229_s24, %s1229_s24, %s905_s6  }
  0x56   : > { %p1232_p6 = scmp.eq.s32.totalorder (!%p1057_p0), %s1022_s10, 0 }
  0x59   : > { %872 = dma.done.wait (%p1232_p6), [#allocation3], 512   ;;  %p1233_p13 = pmov %p1232_p6 }
  0x5a   : > { %s232_s27 = sand.u32 1, %s1022_s10   ;;  %s1110_s28 = sand.u32 1, %s889_s16  }
  0x5b   : > { %874 = vsyncadd (%p1233_p13), [#allocation3], 4294966784  ;;  %s589_s9 = sshll.u32 %s1110_s28, 4  ;;  %s233_s14 = scalar_lea.sflag [#allocation6], %s232_s27 }
  0x5c   : > { %s1115_s23 = scalar_lea.vmem [#allocation5], %s589_s9  ;;  %p1234_p0 = scmp.ne.s32.totalorder %s1225_s12, 0 }
  0x5e   : > { %876 = dma.done.wait (%p1234_p0), %s233_s14, 4352  }
  0x5f   : > { %878 = vsyncadd (%p1234_p0), %s233_s14, 4294962944  ;;  %s590_s20 = sshll.u32 %s1110_s28, 8  ;;  %v284_v32 = vld [vmem:[#allocation2 + $0x8] sm:$0xff]  ;;  %v286_v33 = vld [vmem:[#allocation2 + $0x18] sm:$0xff]  ;;  %p279_p8 = scmp.lt.s32.totalorder %s1022_s10, 1  ;;  %v418_v63 = vlaneseq }
  0x60   : > { %s1122_s7 = scalar_lea.vmem [#allocation7], %s590_s20  ;;  %v283_v34 = vld [vmem:[#allocation2] sm:$0xff]  ;;  %v285_v35 = vld [vmem:[#allocation2 + $0x10] sm:$0xff]  ;;  %383 = vmatprep.mubr.f32.mxu0 %v284_v32  ;;  %388 = vmatprep.mubr.f32.mxu1 %v286_v33  ;;  %s595_s24 = sshll.u32 %s1022_s10, 7 }
  0x61   : > { %v318_v0 = vld [vmem:[%s1122_s7 + $0xf8] sm:$0xff]  ;;  %v317_v2 = vld [vmem:[%s1122_s7 + $0xf0] sm:$0xff]  ;;  %v316_v4 = vld [vmem:[%s1122_s7 + $0xe8] sm:$0xff]  ;;  %s280_s12 = scalar_select %p279_p8, %s1022_s10, 1 }
  0x62   : > { %v302_v1 = vld [vmem:[%s1122_s7 + $0x78] sm:$0xff]  ;;  %598 = vmatprep.subr.mxu0 %v318_v0  ;;  %636 = vmatprep.subr.mxu1 %v318_v0  ;;  %v301_v3 = vld [vmem:[%s1122_s7 + $0x70] sm:$0xff]  ;;  %v300_v5 = vld [vmem:[%s1122_s7 + $0x68] sm:$0xff]  ;;  %v419_v0 = vshrl.u32 %v418_v63, 7  ;;  %s278_s25 = scalar_lea.vmem [#allocation8], %s589_s9  ;;  %s1169_s27 = scalar_lea.hbm %s1218_s4, %s595_s24 }
  0x63   : > { %599 = vmatpush3.msra.mxu0 %v302_v1  ;;  %652 = vmatpush3.msra.mxu1 %v302_v1  ;;  %v315_v6 = vld [vmem:[%s1122_s7 + $0xe0] sm:$0xff]  ;;  %v314_v8 = vld [vmem:[%s1122_s7 + $0xd8] sm:$0xff]  ;;  %v313_v10 = vld [vmem:[%s1122_s7 + $0xd0] sm:$0xff]  ;;  %s592_s13 = sshll.u32 %s280_s12, 1  ;;  %s462_s6 = sshll.u32 %s278_s25, 4  ;;  %s1171_s6 = int_to_ptr.vmem [resolvable:$true] %s462_s6 }
  0x64   : > { %600 = vmatprep.subr.mxu0 %v317_v2  ;;  %637 = vmatprep.subr.mxu1 %v317_v2  ;;  %v299_v7 = vld [vmem:[%s1122_s7 + $0x60] sm:$0xff]  ;;  %v298_v9 = vld [vmem:[%s1122_s7 + $0x58] sm:$0xff]  ;;  %v297_v11 = vld [vmem:[%s1122_s7 + $0x50] sm:$0xff]  ;;  %s282_s30 = scalar_lea.vmem %s1217_s3, %s592_s13  ;;  %v420_v2 = vsub.s32 0, %v419_v0  ;;  %s450_s10 = scalar_lea.sflag [#allocation4], %s1110_s28 }
  0x65   : > { %601 = vmatpush3.msra.mxu0 %v301_v3  ;;  %653 = vmatpush3.msra.mxu1 %v301_v3  ;;  %v312_v12 = vld [vmem:[%s1122_s7 + $0xc8] sm:$0xff]  ;;  %v311_v14 = vld [vmem:[%s1122_s7 + $0xc0] sm:$0xff]  ;;  %v310_v16 = vld [vmem:[%s1122_s7 + $0xb8] sm:$0xff]  ;;  %s829_s9 = scalar_lea.vmem %s1171_s6, 256  ;;  %p1235_p9 = scmp.ne.s32.totalorder %s1226_s29, 0 }
  0x66   : > { %602 = vmatprep.subr.mxu0 %v316_v4  ;;  %638 = vmatprep.subr.mxu1 %v316_v4  ;;  %v296_v13 = vld [vmem:[%s1122_s7 + $0x48] sm:$0xff]  ;;  %v295_v15 = vld [vmem:[%s1122_s7 + $0x40] sm:$0xff]  ;;  %v294_v17 = vld [vmem:[%s1122_s7 + $0x38] sm:$0xff]  ;;  %p830_p10 = scmp.ne.s32.totalorder %s1171_s6, %s829_s9  ;;  %s906_s14 = smov [#allocation8]  }
  0x67   : > { %603 = vmatpush3.msra.mxu0 %v300_v5  ;;  %654 = vmatpush3.msra.mxu1 %v300_v5  ;;  %v309_v18 = vld [vmem:[%s1122_s7 + $0xb0] sm:$0xff]  ;;  %v308_v20 = vld [vmem:[%s1122_s7 + $0xa8] sm:$0xff]  ;;  %v307_v22 = vld [vmem:[%s1122_s7 + $0xa0] sm:$0xff] }
  0x68   : > { %604 = vmatprep.subr.mxu0 %v315_v6  ;;  %639 = vmatprep.subr.mxu1 %v315_v6  ;;  %v293_v19 = vld [vmem:[%s1122_s7 + $0x30] sm:$0xff]  ;;  %v292_v21 = vld [vmem:[%s1122_s7 + $0x28] sm:$0xff]  ;;  %v291_v23 = vld [vmem:[%s1122_s7 + $0x20] sm:$0xff]  ;;  %p831_p4 = pnand %p830_p10, %p1235_p9 }
  0x69   : > { %605 = vmatpush3.msra.mxu0 %v299_v7  ;;  %655 = vmatpush3.msra.mxu1 %v299_v7  ;;  %v306_v24 = vld [vmem:[%s1122_s7 + $0x98] sm:$0xff]  ;;  %v305_v26 = vld [vmem:[%s1122_s7 + $0x90] sm:$0xff]  ;;  %v304_v28 = vld [vmem:[%s1122_s7 + $0x88] sm:$0xff] }
  0x6a   : > { %606 = vmatprep.subr.mxu0 %v314_v8  ;;  %640 = vmatprep.subr.mxu1 %v314_v8  ;;  %v290_v25 = vld [vmem:[%s1122_s7 + $0x18] sm:$0xff]  ;;  %v289_v27 = vld [vmem:[%s1122_s7 + $0x10] sm:$0xff]  ;;  %v288_v29 = vld [vmem:[%s1122_s7 + $0x8] sm:$0xff]  ;;  %p832_p1 = pneg %p831_p4 }
  0x6b   : > { %607 = vmatpush3.msra.mxu0 %v298_v9  ;;  %656 = vmatpush3.msra.mxu1 %v298_v9  ;;  %v303_v30 = vld [vmem:[%s1122_s7 + $0x80] sm:$0xff] }
  0x6c   : > { %608 = vmatprep.subr.mxu0 %v313_v10  ;;  %641 = vmatprep.subr.mxu1 %v313_v10  ;;  %v287_v31 = vld [vmem:[%s1122_s7] sm:$0xff] }
  0x6d   : > { %609 = vmatpush3.msra.mxu0 %v297_v11  ;;  %657 = vmatpush3.msra.mxu1 %v297_v11  ;;  %v416_v1 = vld [vmem:[%s282_s30] sm:$0x1]  ;;  %v593_v6 = vld [vmem:[%s282_s30 + $0x1] ss:$0 sm:$0xff] }
  0x6e   : > { %610 = vmatprep.subr.mxu0 %v312_v12  ;;  %642 = vmatprep.subr.mxu1 %v312_v12 }
  0x6f   : > { %611 = vmatpush3.msra.mxu0 %v296_v13  ;;  %658 = vmatpush3.msra.mxu1 %v296_v13 }
  0x70   : > { %612 = vmatprep.subr.mxu0 %v311_v14  ;;  %643 = vmatprep.subr.mxu1 %v311_v14 }
  0x71   : > { %613 = vmatpush3.msra.mxu0 %v295_v15  ;;  %659 = vmatpush3.msra.mxu1 %v295_v15 }
  0x72   : > { %614 = vmatprep.subr.mxu0 %v310_v16  ;;  %644 = vmatprep.subr.mxu1 %v310_v16 }
  0x73   : > { %615 = vmatpush3.msra.mxu0 %v294_v17  ;;  %660 = vmatpush3.msra.mxu1 %v294_v17 }
  0x74   : > { %616 = vmatprep.subr.mxu0 %v309_v18  ;;  %645 = vmatprep.subr.mxu1 %v309_v18 }
  0x75   : > { %617 = vmatpush3.msra.mxu0 %v293_v19  ;;  %661 = vmatpush3.msra.mxu1 %v293_v19  ;;  %v431_v19 = vld [vmem:[%s1115_s23] sm:$0xff] }
  0x76   : > { %618 = vmatprep.subr.mxu0 %v308_v20  ;;  %646 = vmatprep.subr.mxu1 %v308_v20  ;;  %v432_v20 = vld [vmem:[%s1115_s23 + $0x8] sm:$0xff]  ;;  %s833_s23 = sshll.u32 %s906_s14, 4  ;;  %s834_s23 = int_to_ptr.vmem [resolvable:$false] %s833_s23 }
  0x77   : > { %619 = vmatpush3.msra.mxu0 %v292_v21  ;;  %662 = vmatpush3.msra.mxu1 %v292_v21  ;;  %s835_s20 = scalar_lea.vmem %s834_s23, 512  ;;  %p836_p5 = scmp.lt.s32.totalorder %s1171_s6, %s834_s23 }
  0x78   : > { %620 = vmatprep.subr.mxu0 %v307_v22  ;;  %647 = vmatprep.subr.mxu1 %v307_v22  ;;  %p837_p12 = scmp.lt.s32.totalorder %s835_s20, %s829_s9 }
  0x79   : > { %621 = vmatpush3.msra.mxu0 %v291_v23  ;;  %663 = vmatpush3.msra.mxu1 %v291_v23 }
  0x7a   : > { %622 = vmatprep.subr.mxu0 %v306_v24  ;;  %648 = vmatprep.subr.mxu1 %v306_v24  ;;  %p838_p2 = por %p837_p12, %p836_p5 }
  0x7b   : > { %623 = vmatpush3.msra.mxu0 %v290_v25  ;;  %664 = vmatpush3.msra.mxu1 %v290_v25 }
  0x7c   : > { %624 = vmatprep.subr.mxu0 %v305_v26  ;;  %649 = vmatprep.subr.mxu1 %v305_v26  ;;  %p839_p7 = pnand %p838_p2, %p832_p1 }
  0x7d   : > { %625 = vmatpush3.msra.mxu0 %v289_v27  ;;  %665 = vmatpush3.msra.mxu1 %v289_v27 }
  0x7e   : > { %626 = vmatprep.subr.mxu0 %v304_v28  ;;  %650 = vmatprep.subr.mxu1 %v304_v28 }
  0x7f   : > { %627 = vmatpush3.msra.mxu0 %v288_v29  ;;  %666 = vmatpush3.msra.mxu1 %v288_v29 }
  0x80   : > { %628 = vmatprep.subr.mxu0 %v303_v30  ;;  %651 = vmatprep.subr.mxu1 %v303_v30 }
  0x81   : > { %629 = vmatpush3.msra.mxu0 %v287_v31  ;;  %667 = vmatpush3.msra.mxu1 %v287_v31 }
  0x82   : > { %384 = vmatmul.mubr.f32.vlgmr.msra.gmra.mxu0 %v283_v34  ;;  %389 = vmatmul.mubr.f32.vlgmr.msra.gmra.mxu1 %v285_v35 }
 0x142   : > { %v630_v36 = vpop.f32.mrf.mxu0  ;;  %v633_v37 = vpop.f32.mrf.mxu1 }
 0x144   : > { %v631_v38 = vpop.f32.mrf.mxu0  ;;  %v634_v39 = vpop.f32.mrf.mxu1 }
 0x145   : > { %v632_v40 = vadd.f32 %v631_v38, %v630_v36  ;;  %v635_v41 = vadd.f32 %v634_v39, %v633_v37 }
 0x147   : > { %v394_v42 = vadd.f32 %v635_v41, %v632_v40 }
 0x149   : > { %v395_v43 = vrot.slane %v394_v42, 4 }
 0x14b   : > { %v396_v44 = vadd.f32 %v395_v43, %v394_v42 }
 0x14d   : > { %v397_v45 = vrot.slane %v396_v44, 2 }
 0x14f   : > { %v398_v46 = vadd.f32 %v397_v45, %v396_v44 }
 0x151   : > { %v399_v47 = vrot.slane %v398_v46, 1 }
 0x153   : > { %v400_v48 = vadd.f32 %v399_v47, %v398_v46 }
 0x155   : > { %v401_v49 = vmul.f32 0.0625, %v400_v48 }
 0x157   : > { %v402_v50 = vsub.f32 %v632_v40, %v401_v49  ;;  %v403_v51 = vsub.f32 %v635_v41, %v401_v49 }
 0x159   : > { %v404_v52 = vmul.f32 %v402_v50, %v402_v50  ;;  %v405_v53 = vmul.f32 %v403_v51, %v403_v51 }
 0x15b   : > { %v406_v54 = vadd.f32 %v405_v53, %v404_v52 }
 0x15d   : > { %v407_v55 = vrot.slane %v406_v54, 4 }
 0x15f   : > { %v408_v56 = vadd.f32 %v407_v55, %v406_v54 }
 0x161   : > { %v409_v57 = vrot.slane %v408_v56, 2 }
 0x163   : > { %v410_v58 = vadd.f32 %v409_v57, %v408_v56 }
 0x165   : > { %v411_v59 = vrot.slane %v410_v58, 1 }
 0x167   : > { %v412_v60 = vadd.f32 %v411_v59, %v410_v58 }
 0x169   : > { %v413_v61 = vmul.f32 0.0625, %v412_v60 }
 0x16b   : > { %v414_v62 = vadd.f32 1e-05, %v413_v61 }
 0x16d   : > { %737 = vrsqrt.f32 %v414_v62 }
 0x17a   : > { %v738_v3 = vpop.eup %737 }
 0x17b   : > { %v417_v4 = vmul.f32 %v738_v3, %v416_v1 }
 0x17d   : > { %v421_v5 = vrot.slane %v417_v4, %v420_v2 }
 0x17f   : > { %v422_v7 = vmul.f32 %v421_v5, %v402_v50  ;;  %v423_v8 = vmul.f32 %v421_v5, %v403_v51 }
 0x181   : > { %v429_v9 = vadd.f32 %v593_v6, %v422_v7  ;;  %v430_v10 = vadd.f32 %v593_v6, %v423_v8 }
 0x183   : > { %v433_v11 = vsub.f32 0.0, %v429_v9  ;;  %v434_v12 = vsub.f32 0.0, %v430_v10 }
 0x185   : > { %v435_v13 = vmul.f32 1.442695, %v433_v11  ;;  %v437_v14 = vmul.f32 1.442695, %v434_v12 }
 0x187   : > { %739 = vpow2.f32 %v435_v13 }
 0x188   : > { %741 = vpow2.f32 %v437_v14 }
 0x194   : > { %v740_v15 = vpop.eup %739 }
 0x195   : > { %v742_v16 = vpop.eup %741  ;;  %v439_v17 = vadd.f32 1.0, %v740_v15 }
 0x196   : > { %v440_v18 = vadd.f32 1.0, %v742_v16 }
 0x197   : > { %743 = vrcp.f32 %v439_v17 }
 0x198   : > { %745 = vrcp.f32 %v440_v18 }
 0x1a4   : > { %v744_v21 = vpop.eup %743 }
 0x1a5   : > { %v746_v22 = vpop.eup %745  ;;  %v445_v23 = vmul.f32 %v744_v21, %v431_v19 }
 0x1a6   : > { %v446_v24 = vmul.f32 %v746_v22, %v432_v20 }
 0x1a7   : > { %447 = vst [vmem:[%s278_s25] sm:$0xff] %v445_v23 }
 0x1a8   : > { %448 = vst [vmem:[%s278_s25 + $0x8] sm:$0xff] %v446_v24 }
 0x1a9   : > { %842 = shalt.err (!%p839_p7)
}
 0x1aa   : > { %s843_s7 = scalar_lea.hbm %s1169_s27, 256  ;;  %s847_s21 = scalar_lea.hbm %s1218_s4, 512 }
 0x1ab   : > { %p844_p11 = scmp.ne.s32.totalorder %s1169_s27, %s843_s7  ;;  %p848_p13 = scmp.lt.s32.totalorder %s1169_s27, %s1218_s4 }
 0x1ac   : > { %p849_p0 = scmp.lt.s32.totalorder %s847_s21, %s843_s7 }
 0x1ad   : > { %p845_p3 = pnand %p844_p11, %p1235_p9 }
 0x1ae   : > { %p850_p8 = por %p849_p0, %p848_p13 }
 0x1af   : > { %p846_p6 = pneg %p845_p3 }
 0x1b1   : > { %p851_p10 = pnand %p850_p8, %p846_p6 }
 0x1b3   : > { %854 = shalt.err (!%p851_p10)
}
 0x1b4   : > { %s907_s24 = smov 128   ;;  %s908_s25 = smov 256  }
 0x1b5   : > { %s909_s11 = smov 8  }
 0x1b6   : > { %676 = dma.vmem_to_hbm [thread:$0]  (%p1235_p9), %s1171_s6, 256, %s1169_s27, %s450_s10, %s907_s24, %s908_s25, %s909_s11  }
 0x1b7 PF: > { %s477_s8 = sand.u32 1, %s885_s15   ;;  %p1236_p4 = scmp.ne.s32.totalorder %s1227_s5, 0 }
 0x1b8   : > { %p1237_p1 = scmp.ge.s32.totalorder %s897_s18, 2  ;;  %s478_s9 = scalar_lea.sflag [#allocation4], %s477_s8 }
 0x1ba   : > { %p690_p5 = pnand %p1237_p1, %p1236_p4 }
 0x1bc   : > { %p691_p12 = pneg %p690_p5 }
 0x1be   : > { %880 = dma.done.wait (%p691_p12), %s478_s9, 256  }
 0x1bf   : > { %882 = vsyncadd (%p691_p12), %s478_s9, 4294967040  ;;  %p18_p2 = scmp.ge.s32.totalorder %s956_s19, 4   ;;  %s1238_s15 = smov %s889_s16 }
 0x1c0   : > { %s1239_s16 = smov %s893_s17  ;;  %s1240_s17 = smov %s966_s22 }
 0x1c1   : > { %s1241_s18 = smov %s956_s19  ;;  %20 = sbr.rel (!%p18_p2) target bundleno = 6 (0x6), region = 100 }
 0x1c6   :  { %483 = vsyncpa [#allocation3], 1 }
 0x1c7   :  { %485 = vsyncpa [#allocation3 + $0x1], 1 }
 0x1c8   :  { %486 = vsyncpa [#allocation6], 1 }
 0x1c9   :  { %488 = vsyncpa [#allocation6 + $0x1], 1 }
 0x1ca   :  { %489 = vsyncpa [#allocation4], 1 }
 0x1cb   :  { %491 = vsyncpa [#allocation4 + $0x1], 1 }

</bundles_post_ra>
